<compile_context>
chip_gen: v7x
topology: tpu7x:2x2x1
jax: 0.10.0
libtpu: 0.0.40
codegen_flags: <defaults>
</compile_context>

<pallas_src>
import functools

import jax
import jax.numpy as jnp
from jax import lax
from jax.experimental import pallas as pl
from jax.experimental.pallas import tpu as pltpu

LANE = 128
SUBLANE = 8
MAX_BLOCK_ROWS = 4096          # 4096 x 128 f32 = 2 MiB per input tile
NUM_PARALLEL = 2               # leading "parallel" grid axis (v7x: one slice per TC)


def _focal_loss_kernel(yt_ref, yp_ref, out_ref, acc_ref, *,
                       gamma, alpha, clamp_probs, rows, block_rows, n_inner,
                       needs_mask):
    i = pl.program_id(0)       # parallel slice
    j = pl.program_id(1)       # inner (reduction) step

    @pl.when(j == 0)
    def _():
        acc_ref[...] = jnp.zeros_like(acc_ref)

    yt = yt_ref[...].astype(jnp.float32)
    yp = yp_ref[...].astype(jnp.float32)
    if clamp_probs:            # static: optional guard against yp outside [0,1] -> NaN
        yp = jnp.clip(yp, 0.0, 1.0)

    # Elementwise BCE with torch's -100 log clamp, algebraically folded:
    #   -(yt*logp + (1-yt)*log1mp) == yt*(log1mp - logp) - log1mp
    log_p = jnp.maximum(jnp.log(yp), -100.0)
    log_1mp = jnp.maximum(jnp.log(1.0 - yp), -100.0)
    bce = yt * (log_1mp - log_p) - log_1mp

    focal = bce
    if gamma:  # static python branch (matches `if self._gamma:`)
        # 1 - p_t = 1 - (yt*yp + (1-yt)*(1-yp)) = yt + yp - 2*yt*yp
        ytyp = yt * yp
        one_minus_pt = (yt + yp) - (ytyp + ytyp)
        g = float(gamma)
        if g == int(g) and 1 <= int(g) <= 8:
            # Integer gamma: repeated multiplication (no EUP pow, no NaN for stale data).
            mod = one_minus_pt
            for _ in range(int(g) - 1):
                mod = mod * one_minus_pt
        else:
            mod = jnp.power(one_minus_pt, jnp.float32(g))
        focal = focal * mod

    if alpha is not None:  # static python branch
        # yt*alpha + (1-yt)*(1-alpha) = (1-alpha) + yt*(2*alpha - 1)
        a = float(alpha)
        focal = focal * (jnp.float32(1.0 - a) + yt * jnp.float32(2.0 * a - 1.0))

    if needs_mask:
        # Single predicate drives both the ragged last block and any clamped overrun
        # blocks: a block needs masking iff it extends past `rows`.
        b = i * n_inner + j                   # logical (unclamped) block index
        row0 = b * block_rows
        block_fully_valid = row0 + block_rows <= rows

        @pl.when(block_fully_valid)
        def _():
            acc_ref[...] += focal             # hot path: plain vector accumulate

        @pl.when(row0 + block_rows > rows)
        def _():
            r = row0 + lax.broadcasted_iota(jnp.int32, focal.shape, 0)
            acc_ref[...] += jnp.where(r < rows, focal, 0.0)
    else:
        acc_ref[...] += focal                 # pure VPU vector accumulation

    @pl.when(j == n_inner - 1)
    def _():
        # Single cross-lane reduce per parallel slice.
        out_ref[0, 0] = jnp.sum(acc_ref[...])


def _focal_terms(yt, yp, gamma, alpha):
    """Elementwise focal terms in plain jnp (used for the <128-element tail)."""
    yt = yt.astype(jnp.float32)
    yp = yp.astype(jnp.float32)
    bce = -(yt * jnp.maximum(jnp.log(yp), -100.0)
            + (1.0 - yt) * jnp.maximum(jnp.log(1.0 - yp), -100.0))
    out = bce
    if gamma:
        p_t = yt * yp + (1.0 - yt) * (1.0 - yp)
        out = out * jnp.power(1.0 - p_t, jnp.float32(gamma))
    if alpha is not None:
        out = out * (yt * alpha + (1.0 - yt) * (1.0 - alpha))
    return out


def focal_loss(y_true, y_pred, gamma=2.0, alpha=0.25, *,
               max_block_rows=MAX_BLOCK_ROWS, num_parallel=NUM_PARALLEL,
               clamp_probs=False):
    """Pallas focal loss. y_true / y_pred: any matching shape (e.g. NCHW probabilities)."""
    assert y_true.shape == y_pred.shape
    count = int(y_true.size)

    yt = jnp.ravel(y_true)
    yp = jnp.ravel(y_pred)

    # Kernel handles the lane-aligned prefix; the <128-element tail is summed in jnp.
    main = (count // LANE) * LANE
    tail = count - main

    tail_sum = jnp.float32(0.0)
    if tail:
        tail_sum = jnp.sum(_focal_terms(yt[main:], yp[main:], gamma, alpha))

    if main == 0:
        return tail_sum / jnp.float32(count)

    rows = main // LANE
    yt2 = (yt[:main] if tail else yt).reshape(rows, LANE)
    yp2 = (yp[:main] if tail else yp).reshape(rows, LANE)

    if rows <= max_block_rows:
        block_rows = rows                                   # single block == full dim
    else:
        block_rows = max(SUBLANE, (max_block_rows // SUBLANE) * SUBLANE)

    n_blocks = pl.cdiv(rows, block_rows)
    n_par = max(1, min(num_parallel, n_blocks))
    n_inner = pl.cdiv(n_blocks, n_par)

    ragged_last = rows % block_rows != 0
    overrun = n_par * n_inner != n_blocks
    needs_mask = ragged_last or overrun

    if overrun:
        # Clamp logical block indices past the end; their contribution is zeroed
        # in-kernel by the same `row0 + block_rows > rows` predicate.
        def in_idx(i, j):
            return (jnp.minimum(i * n_inner + j, n_blocks - 1), 0)
    else:
        def in_idx(i, j):
            return (i * n_inner + j, 0)

    tile_spec = pl.BlockSpec((block_rows, LANE), in_idx)

    kernel = functools.partial(
        _focal_loss_kernel, gamma=gamma, alpha=alpha, clamp_probs=clamp_probs,
        rows=rows, block_rows=block_rows, n_inner=n_inner, needs_mask=needs_mask)

    partials = pl.pallas_call(
        kernel,
        out_shape=jax.ShapeDtypeStruct((n_par, 1), jnp.float32),
        grid=(n_par, n_inner),
        in_specs=[tile_spec, tile_spec],
        out_specs=pl.BlockSpec((1, 1), lambda i, j: (i, 0),
                               memory_space=pltpu.SMEM),
        scratch_shapes=[pltpu.VMEM((block_rows, LANE), jnp.float32)],
        compiler_params=pltpu.CompilerParams(
            dimension_semantics=("parallel", "arbitrary"),
            vmem_limit_bytes=32 * 1024 * 1024),
    )(yt2, yp2)

    return (jnp.sum(partials) + tail_sum) / jnp.float32(count)


def focal_loss_ref(y_true, y_pred, gamma=2.0, alpha=0.25):
    y_true = y_true.astype(jnp.float32)
    y_pred = y_pred.astype(jnp.float32)
    bce = -(y_true * jnp.maximum(jnp.log(y_pred), -100.0)
            + (1.0 - y_true) * jnp.maximum(jnp.log(1.0 - y_pred), -100.0))
    p_t = y_true * y_pred + (1.0 - y_true) * (1.0 - y_pred)
    mod = jnp.power(1.0 - p_t, gamma)
    aw = y_true * alpha + (1.0 - y_true) * (1.0 - alpha)
    return jnp.mean(mod * aw * bce)


if __name__ == "__main__":
    key = jax.random.PRNGKey(0)
    k1, k2 = jax.random.split(key)

    # NCHW: batch=2, channels=4, spatial=16x16 (2048 elems, lane-aligned -> no copies).
    shape = (2, 4, 16, 16)
    y_pred = jax.nn.sigmoid(jax.random.normal(k1, shape, dtype=jnp.float32))
    y_true = (jax.random.uniform(k2, shape) > 0.5).astype(jnp.float32)

    out = jax.block_until_ready(focal_loss(y_true, y_pred, gamma=2.0, alpha=0.25))
    ref = focal_loss_ref(y_true, y_pred, gamma=2.0, alpha=0.25)
    assert jnp.allclose(out, ref, rtol=1e-4, atol=1e-6), (out, ref)

    # bf16 streaming path (halves HBM traffic on v5e; kernel upcasts to f32 internally).
    out_bf = jax.block_until_ready(
        focal_loss(y_true.astype(jnp.bfloat16), y_pred.astype(jnp.bfloat16)))
    ref_bf = focal_loss_ref(y_true.astype(jnp.bfloat16), y_pred.astype(jnp.bfloat16))
    assert jnp.allclose(out_bf, ref_bf, rtol=1e-4, atol=1e-6), (out_bf, ref_bf)

    # Ragged path: 6555 elems -> 51 lane-rows in-kernel (pl.when-gated tail-block mask)
    # plus a 27-element jnp tail in the wrapper; multi-block 2-D grid.
    shape2 = (3, 5, 19, 23)
    y_pred2 = jax.nn.sigmoid(jax.random.normal(k1, shape2, dtype=jnp.float32))
    y_true2 = (jax.random.uniform(k2, shape2) > 0.5).astype(jnp.float32)
    out2 = jax.block_until_ready(
        focal_loss(y_true2, y_pred2, gamma=2.0, alpha=0.25, max_block_rows=16))
    ref2 = focal_loss_ref(y_true2, y_pred2, gamma=2.0, alpha=0.25)
    assert jnp.allclose(out2, ref2, rtol=1e-4, atol=1e-6), (out2, ref2)

    # Overrun path: 20 rows / block_rows=8 -> 3 blocks split over 2 parallel slices
    # (clamped index_map + same in-kernel predicate zeroes the duplicate block).
    shape3 = (2, 4, 16, 20)
    y_pred3 = jax.nn.sigmoid(jax.random.normal(k1, shape3, dtype=jnp.float32))
    y_true3 = (jax.random.uniform(k2, shape3) > 0.5).astype(jnp.float32)
    out3 = jax.block_until_ready(
        focal_loss(y_true3, y_pred3, gamma=2.0, alpha=0.25, max_block_rows=8))
    ref3 = focal_loss_ref(y_true3, y_pred3, gamma=2.0, alpha=0.25)
    assert jnp.allclose(out3, ref3, rtol=1e-4, atol=1e-6), (out3, ref3)

    print("KERNEL_OK")
</pallas_src>

<mosaic_0001>
module attributes {stable_mosaic.version = 11 : i64} {
  func.func @_focal_loss_kernel(%arg0: i32, %arg1: i32, %arg2: memref<16x128xf32, #tpu.memory_space<vmem>>, %arg3: memref<16x128xf32, #tpu.memory_space<vmem>>, %arg4: memref<1x1xf32, #tpu.memory_space<smem>>, %arg5: memref<16x128xf32, #tpu.memory_space<vmem>>) attributes {dimension_semantics = [#tpu.dimension_semantics<parallel>, #tpu.dimension_semantics<arbitrary>], iteration_bounds = array<i64: 1, 1>, scalar_prefetch = 0 : i64, scratch_operands = 1 : i64, tpu.core_type = #tpu.core_type<tc>, window_params = [{transform_indices = @transform_0, window_bounds = array<i64: 16, 128>}, {transform_indices = @transform_1, window_bounds = array<i64: 16, 128>}, {transform_indices = @transform_2, window_bounds = array<i64: 1, 1>}]} {
    %c0_i32 = arith.constant 0 : i32
    %0 = arith.cmpi eq, %arg1, %c0_i32 : i32
    %1 = arith.extui %0 : i1 to i32
    %c0_i32_0 = arith.constant 0 : i32
    %2 = arith.cmpi ne, %1, %c0_i32_0 : i32
    scf.if %2 {
      %cst_14 = arith.constant 0.000000e+00 : f32
      %33 = vector.broadcast %cst_14 : f32 to vector<16x128xf32>
      %c0_15 = arith.constant 0 : index
      %c0_16 = arith.constant 0 : index
      %34 = vector.load %arg5[%c0_15, %c0_16] : memref<16x128xf32, #tpu.memory_space<vmem>>, vector<16x128xf32>
      tpu.vector_store %arg5[%c0_15, %c0_16], %33 {strides = array<i32>} : memref<16x128xf32, #tpu.memory_space<vmem>>, vector<16x128xf32>,
    } else {
    }
    %c0 = arith.constant 0 : index
    %c0_1 = arith.constant 0 : index
    %3 = vector.load %arg2[%c0, %c0_1] : memref<16x128xf32, #tpu.memory_space<vmem>>, vector<16x128xf32>
    %c0_2 = arith.constant 0 : index
    %c0_3 = arith.constant 0 : index
    %4 = vector.load %arg3[%c0_2, %c0_3] : memref<16x128xf32, #tpu.memory_space<vmem>>, vector<16x128xf32>
    %5 = math.log %4 : vector<16x128xf32>
    %cst = arith.constant -1.000000e+02 : f32
    %6 = vector.broadcast %cst : f32 to vector<16x128xf32>
    %7 = arith.maximumf %5, %6 : vector<16x128xf32>
    %cst_4 = arith.constant 1.000000e+00 : f32
    %8 = vector.broadcast %cst_4 : f32 to vector<16x128xf32>
    %9 = arith.subf %8, %4 : vector<16x128xf32>
    %10 = math.log %9 : vector<16x128xf32>
    %cst_5 = arith.constant -1.000000e+02 : f32
    %11 = vector.broadcast %cst_5 : f32 to vector<16x128xf32>
    %12 = arith.maximumf %10, %11 : vector<16x128xf32>
    %13 = arith.subf %12, %7 : vector<16x128xf32>
    %14 = arith.mulf %3, %13 : vector<16x128xf32>
    %15 = arith.subf %14, %12 : vector<16x128xf32>
    %16 = arith.mulf %3, %4 : vector<16x128xf32>
    %17 = arith.addf %3, %4 : vector<16x128xf32>
    %18 = arith.addf %16, %16 : vector<16x128xf32>
    %19 = arith.subf %17, %18 : vector<16x128xf32>
    %20 = arith.mulf %19, %19 : vector<16x128xf32>
    %21 = arith.mulf %15, %20 : vector<16x128xf32>
    %cst_6 = arith.constant -5.000000e-01 : f32
    %22 = vector.broadcast %cst_6 : f32 to vector<16x128xf32>
    %23 = arith.mulf %3, %22 : vector<16x128xf32>
    %cst_7 = arith.constant 7.500000e-01 : f32
    %24 = vector.broadcast %cst_7 : f32 to vector<16x128xf32>
    %25 = arith.addf %24, %23 : vector<16x128xf32>
    %26 = arith.mulf %21, %25 : vector<16x128xf32>
    %c0_8 = arith.constant 0 : index
    %c0_9 = arith.constant 0 : index
    %27 = vector.load %arg5[%c0_8, %c0_9] : memref<16x128xf32, #tpu.memory_space<vmem>>, vector<16x128xf32>
    %28 = arith.addf %27, %26 : vector<16x128xf32>
    %c0_10 = arith.constant 0 : index
    %c0_11 = arith.constant 0 : index
    %29 = vector.load %arg5[%c0_10, %c0_11] : memref<16x128xf32, #tpu.memory_space<vmem>>, vector<16x128xf32>
    tpu.vector_store %arg5[%c0_10, %c0_11], %28 {strides = array<i32>} : memref<16x128xf32, #tpu.memory_space<vmem>>, vector<16x128xf32>,
    %c0_i32_12 = arith.constant 0 : i32
    %30 = arith.cmpi eq, %arg1, %c0_i32_12 : i32
    %31 = arith.extui %30 : i1 to i32
    %c0_i32_13 = arith.constant 0 : i32
    %32 = arith.cmpi ne, %31, %c0_i32_13 : i32
    scf.if %32 {
      %c0_14 = arith.constant 0 : index
      %c0_15 = arith.constant 0 : index
      %33 = vector.load %arg5[%c0_14, %c0_15] : memref<16x128xf32, #tpu.memory_space<vmem>>, vector<16x128xf32>
      %34 = vector.shape_cast %33 : vector<16x128xf32> to vector<1x16x128xf32>
      %cst_16 = arith.constant dense<0.000000e+00> : vector<1xf32>
      %35 = vector.multi_reduction <add>, %34, %cst_16 [1, 2] : vector<1x16x128xf32> to vector<1xf32>
      %36 = vector.shape_cast %35 : vector<1xf32> to vector<1x1x1xf32>
      %37 = vector.extract %36[0, 0, 0] : f32 from vector<1x1x1xf32>
      %c0_17 = arith.constant 0 : index
      %c0_18 = arith.constant 0 : index
      %38 = memref.load %arg4[%c0_17, %c0_18] : memref<1x1xf32, #tpu.memory_space<smem>>
      memref.store %37, %arg4[%c0_17, %c0_18] : memref<1x1xf32, #tpu.memory_space<smem>>
    } else {
    }
    return
  }
  func.func @transform_0(%arg0: i32, %arg1: i32) -> (i32, i32) {
    %c1_i32 = arith.constant 1 : i32
    %0 = arith.muli %arg0, %c1_i32 : i32
    %1 = arith.addi %0, %arg1 : i32
    %c0_i32 = arith.constant 0 : i32
    %c0_i32_0 = arith.constant 0 : i32
    return %1, %c0_i32 : i32, i32
  }
  func.func @transform_1(%arg0: i32, %arg1: i32) -> (i32, i32) {
    %c1_i32 = arith.constant 1 : i32
    %0 = arith.muli %arg0, %c1_i32 : i32
    %1 = arith.addi %0, %arg1 : i32
    %c0_i32 = arith.constant 0 : i32
    %c0_i32_0 = arith.constant 0 : i32
    return %1, %c0_i32 : i32, i32
  }
  func.func @transform_2(%arg0: i32, %arg1: i32) -> (i32, i32) {
    %c0_i32 = arith.constant 0 : i32
    %c0_i32_0 = arith.constant 0 : i32
    return %arg0, %c0_i32 : i32, i32
  }
}

</mosaic_0001>

<bundles_post_ra>
// kernel: tpu_custom_call.1
= control target key start
LH: loop header
LB: loop body
LE: loop exit
PB: predicated region body
PF: predicated region fallthrough
CT: control target
= control target key end

     0   :  { %7 = vsyncpa [#allocation4], 0  ;;  %s269_s0 = inlined_call_operand.hbm [shape: f32[16,128], index: 0, kind: input, shape index: {}]   ;;  %s270_s1 = inlined_call_operand.hbm [shape: f32[16,128], index: 1, kind: input, shape index: {}]   ;;  %s271_s2 = inlined_call_operand.hbm [shape: f32[1,1], index: 2, kind: output, shape index: {}]  }
   0x1   :  { %8 = vsyncpa [#allocation7], 0 }
   0x2   :  { %9 = vsyncpa [#allocation5], 0  ;;  %s213_s9 = smov [#allocation3]   ;;  %s153_s13 = scalar_lea.hbm %s269_s0, 256 }
   0x3   :  { %s19_s10 = sshll.u32 %s213_s9, 4  ;;  %p154_p0 = scmp.ne.s32.totalorder %s269_s0, %s153_s13  ;;  %s20_s10 = int_to_ptr.vmem [resolvable:$true] %s19_s10 }
   0x4   :  { %p157_p1 = scmp.lt.u32.totalorder %s153_s13, %s269_s0 }
   0x6   :  { %p159_p2 = pnand %p157_p1, %p154_p0 }
   0x8   :  { %162 = shalt.err (!%p159_p2)
}
   0x9   :  { %s163_s18 = scalar_lea.vmem %s20_s10, 256  ;;  %p168_p4 = scmp.lt.s32.totalorder %s20_s10, %s20_s10 }
   0xa   :  { %p164_p3 = scmp.ne.s32.totalorder %s20_s10, %s163_s18  ;;  %p169_p5 = scmp.lt.s32.totalorder %s163_s18, %s163_s18 }
   0xc   :  { %p170_p6 = por %p169_p5, %p168_p4 }
   0xe   :  { %p171_p7 = pnand %p170_p6, %p164_p3 }
  0x10   :  { %174 = shalt.err (!%p171_p7)
}
  0x11   :  { %s214_s19 = smov 128   ;;  %s215_s20 = smov 8  }
  0x12   :  { %25 = dma.hbm_to_vmem [thread:$0]  %s269_s0, 256, %s20_s10, [#allocation4], %s214_s19, %s214_s19, %s215_s20  }
  0x13   :  { %s216_s23 = smov [#allocation6]   ;;  %s175_s27 = scalar_lea.hbm %s270_s1, 256 }
  0x14   :  { %s35_s24 = sshll.u32 %s216_s23, 4  ;;  %p176_p8 = scmp.ne.s32.totalorder %s270_s1, %s175_s27  ;;  %s36_s24 = int_to_ptr.vmem [resolvable:$true] %s35_s24 }
  0x15   :  { %p179_p9 = scmp.lt.u32.totalorder %s175_s27, %s270_s1 }
  0x17   :  { %p181_p10 = pnand %p179_p9, %p176_p8 }
  0x19   :  { %184 = shalt.err (!%p181_p10)
}
  0x1a   :  { %s185_s4 = scalar_lea.vmem %s36_s24, 256  ;;  %p190_p12 = scmp.lt.s32.totalorder %s36_s24, %s36_s24 }
  0x1b   :  { %p186_p11 = scmp.ne.s32.totalorder %s36_s24, %s185_s4  ;;  %p191_p13 = scmp.lt.s32.totalorder %s185_s4, %s185_s4 }
  0x1d   :  { %p192_p0 = por %p191_p13, %p190_p12 }
  0x1f   :  { %p193_p1 = pnand %p192_p0, %p186_p11 }
  0x21   :  { %196 = shalt.err (!%p193_p1)
}
  0x22   :  { %41 = dma.hbm_to_vmem [thread:$0]  %s270_s1, 256, %s36_s24, [#allocation7], %s214_s19, %s214_s19, %s215_s20  }
  0x23   :  { %207 = dma.done.wait [#allocation4], 256  }
  0x24   :  { %208 = vsyncadd [#allocation4], 4294967040 }
  0x25   :  { %209 = dma.done.wait [#allocation7], 256  }
  0x26   :  { %210 = vsyncadd [#allocation7], 4294967040  ;;  %v60_v0 = vld [vmem:[#allocation6] sm:$0xff]  ;;  %v61_v1 = vld [vmem:[#allocation6 + $0x8] sm:$0xff]  ;;  %s197_s8 = scalar_lea.hbm %s271_s2, 16 }
  0x27   :  { %145 = vlog2.f32 %v60_v0  ;;  %v68_v2 = vsub.f32 1.0, %v60_v0  ;;  %v69_v3 = vsub.f32 1.0, %v61_v1  ;;  %v58_v4 = vld [vmem:[#allocation3] sm:$0xff]  ;;  %v59_v5 = vld [vmem:[#allocation3 + $0x8] sm:$0xff]  ;;  %p198_p2 = scmp.ne.s32.totalorder %s271_s2, %s197_s8  ;;  %p201_p3 = scmp.lt.u32.totalorder %s197_s8, %s271_s2 }
  0x28   :  { %147 = vlog2.f32 %v61_v1  ;;  %v82_v6 = vmul.f32 %v60_v0, %v58_v4  ;;  %v83_v7 = vmul.f32 %v61_v1, %v59_v5  ;;  %v84_v11 = vadd.f32 %v60_v0, %v58_v4 }
  0x29   :  { %149 = vlog2.f32 %v68_v2  ;;  %v85_v15 = vadd.f32 %v61_v1, %v59_v5  ;;  %v94_v27 = vmul.f32 -0.5, %v58_v4  ;;  %v95_v29 = vmul.f32 -0.5, %v59_v5  ;;  %p203_p4 = pnand %p201_p3, %p198_p2 }
  0x2a   :  { %151 = vlog2.f32 %v69_v3  ;;  %v86_v12 = vadd.f32 %v82_v6, %v82_v6  ;;  %v87_v16 = vadd.f32 %v83_v7, %v83_v7 }
  0x2b   :  { %v96_v35 = vadd.f32 0.75, %v94_v27  ;;  %v97_v37 = vadd.f32 0.75, %v95_v29 }
  0x2c   :  { %v88_v23 = vsub.f32 %v84_v11, %v86_v12  ;;  %v89_v25 = vsub.f32 %v85_v15, %v87_v16 }
  0x2e   :  { %v90_v31 = vmul.f32 %v88_v23, %v88_v23  ;;  %v91_v33 = vmul.f32 %v89_v25, %v89_v25 }
  0x31   :  { %v146_v8 = vpop.eup %145 }
  0x32   :  { %v148_v9 = vpop.eup %147  ;;  %v63_v10 = vmul.f32 0.6931472, %v146_v8 }
  0x33   :  { %v150_v13 = vpop.eup %149  ;;  %v65_v14 = vmul.f32 0.6931472, %v148_v9 }
  0x34   :  { %v152_v17 = vpop.eup %151  ;;  %v66_v18 = vmax.f32 %v63_v10, -100.0  ;;  %v71_v19 = vmul.f32 0.6931472, %v150_v13 }
  0x35   :  { %v67_v20 = vmax.f32 %v65_v14, -100.0  ;;  %v73_v21 = vmul.f32 0.6931472, %v152_v17 }
  0x36   :  { %v74_v22 = vmax.f32 %v71_v19, -100.0 }
  0x37   :  { %v75_v24 = vmax.f32 %v73_v21, -100.0 }
  0x38   :  { %v76_v26 = vsub.f32 %v74_v22, %v66_v18 }
  0x39   :  { %v77_v28 = vsub.f32 %v75_v24, %v67_v20 }
  0x3a   :  { %v78_v30 = vmul.f32 %v76_v26, %v58_v4 }
  0x3b   :  { %v79_v32 = vmul.f32 %v77_v28, %v59_v5 }
  0x3c   :  { %v80_v34 = vsub.f32 %v78_v30, %v74_v22 }
  0x3d   :  { %v81_v36 = vsub.f32 %v79_v32, %v75_v24 }
  0x3e   :  { %v92_v38 = vmul.f32 %v90_v31, %v80_v34 }
  0x3f   :  { %v93_v39 = vmul.f32 %v91_v33, %v81_v36 }
  0x40   :  { %v98_v40 = vmul.f32 %v96_v35, %v92_v38 }
  0x41   :  { %v99_v41 = vmul.f32 %v97_v37, %v93_v39 }
  0x43   :  { %v111_v42 = vadd.f32 %v99_v41, %v98_v40 }
  0x45   :  { %112 = vadd.xlane.f32.xlu0 %v111_v42 }
  0xd2   :  { %v113_v43 = vpop.xlane.xlu0 %112 }
  0xd3   :  { %v114_v44 = vrot.slane %v113_v43, 4 }
  0xd5   :  { %v115_v45 = vadd.f32 %v114_v44, %v113_v43 }
  0xd7   :  { %v116_v46 = vrot.slane %v115_v45, 2 }
  0xd9   :  { %v117_v47 = vadd.f32 %v116_v46, %v115_v45 }
  0xdb   :  { %v118_v48 = vrot.slane %v117_v47, 1 }
  0xdd   :  { %v119_v49 = vadd.f32 %v118_v48, %v117_v47 }
  0xdf   :  { %138 = vpush %v119_v49 }
 0x110   :  { %s139_s1 = spop %138 }
 0x111   :  { %122 = sst [smem:[#allocation8]] %s139_s1 }
 0x112   :  { %206 = shalt.err (!%p203_p4)
}
 0x113   :  { %s217_s13 = smov [#allocation8]  }
 0x114   :  { %130 = dma.smem_to_hbm %s217_s13, 16, %s271_s2, [#allocation5]  }
 0x115   :  { %211 = dma.done.wait [#allocation5], 16  }
 0x116   :  { %212 = vsyncadd [#allocation5], 4294967280 }
 0x117   :  { %134 = sfence }
 0x118   :  { %135 = vsyncpa [#allocation4], 1 }
 0x119   :  { %136 = vsyncpa [#allocation7], 1 }
 0x11a   :  { %137 = vsyncpa [#allocation5], 1 }

</bundles_post_ra>
